<compile_context>
chip_gen: v7x
topology: tpu7x:2x2x1
jax: 0.10.0
libtpu: 0.0.40
codegen_flags: <defaults>
</compile_context>

<pallas_src>
import functools

import numpy as np
import jax
import jax.numpy as jnp
from jax.experimental import pallas as pl
from jax.experimental.pallas import tpu as pltpu

ACT_NONE, ACT_RELU, ACT_RELU6, ACT_SIGMOID = 0, 1, 2, 3
BF16 = jnp.bfloat16
VMEM_LIMIT_BYTES = 32 * 1024 * 1024


def _round_up(x, m):
    return ((x + m - 1) // m) * m


def _apply_act(y, act):
    if act == ACT_RELU:
        return jnp.maximum(y, 0.0)
    if act == ACT_RELU6:
        return jnp.clip(y, 0.0, 6.0)
    if act == ACT_SIGMOID:
        return 1.0 / (1.0 + jnp.exp(-y))
    return y


def _cparams(n_axes):
    return pltpu.CompilerParams(
        dimension_semantics=("parallel",) * n_axes,
        vmem_limit_bytes=VMEM_LIMIT_BYTES)


# ---------------------------------------------------------------------------
# Kernel A: fused multi-input matmul (+BN affine, +residual, +activation)
# ---------------------------------------------------------------------------
def _mm_fused_kernel(*refs, n_in, act, has_affine, has_res):
    o_ref = refs[-1]
    xs = refs[:n_in]
    ws = refs[n_in:2 * n_in]
    idx = 2 * n_in
    y = jnp.dot(xs[0][...], ws[0][...], preferred_element_type=jnp.float32)
    for i in range(1, n_in):
        y = y + jnp.dot(xs[i][...], ws[i][...],
                        preferred_element_type=jnp.float32)
    if has_affine:
        y = y * refs[idx][...] + refs[idx + 1][...]
        idx += 2
    if has_res:
        y = y + refs[idx][...].astype(jnp.float32)
    o_ref[...] = _apply_act(y, act).astype(o_ref.dtype)


def matmul_fused(xs, ws, scale=None, bias=None, act=ACT_NONE, res=None,
                 out_dtype=BF16, tm=256):
    """out = act((sum_i xs[i] @ ws[i]) * scale + bias + res).

    Operands cast to bf16 for the MXU; accumulation / affine math in f32.
    xs[i]: (M, K_i), ws[i]: (K_i, N), scale/bias: (N,), res: (M, N).
    """
    xs = [x.astype(BF16) for x in xs]
    ws = [w.astype(BF16) for w in ws]
    M = xs[0].shape[0]
    N = ws[0].shape[1]
    tm = min(tm, _round_up(M, 16))
    Mp = _round_up(M, tm)
    if Mp != M:
        xs = [jnp.pad(x, ((0, Mp - M), (0, 0))) for x in xs]
        if res is not None:
            res = jnp.pad(res, ((0, Mp - M), (0, 0)))
    has_affine = scale is not None
    has_res = res is not None

    operands = list(xs) + list(ws)
    in_specs = [pl.BlockSpec((tm, int(x.shape[1])), lambda i: (i, 0))
                for x in xs]
    in_specs += [pl.BlockSpec((int(w.shape[0]), N), lambda i: (0, 0))
                 for w in ws]
    if has_affine:
        operands += [scale.reshape(1, N).astype(jnp.float32),
                     bias.reshape(1, N).astype(jnp.float32)]
        in_specs += [pl.BlockSpec((1, N), lambda i: (0, 0)),
                     pl.BlockSpec((1, N), lambda i: (0, 0))]
    if has_res:
        operands.append(res)
        in_specs.append(pl.BlockSpec((tm, N), lambda i: (i, 0)))

    out = pl.pallas_call(
        functools.partial(_mm_fused_kernel, n_in=len(xs), act=act,
                          has_affine=has_affine, has_res=has_res),
        out_shape=jax.ShapeDtypeStruct((Mp, N), out_dtype),
        grid=(Mp // tm,),
        in_specs=in_specs,
        out_specs=pl.BlockSpec((tm, N), lambda i: (i, 0)),
        compiler_params=_cparams(1),
    )(*operands)
    return out[:M] if Mp != M else out


def pointwise_bn_act(x, p, act, res=None):
    N, H, W, C = x.shape
    rm = None if res is None else res.reshape(N * H * W, res.shape[-1])
    y = matmul_fused([x.reshape(N * H * W, C)], [p['w']], p['s'], p['b'],
                     act=act, res=rm)
    return y.reshape(N, H, W, -1)


# ---------------------------------------------------------------------------
# Kernel B: KxK stride-1 (dilated) conv via in-kernel tap accumulation
# ---------------------------------------------------------------------------
def _conv_tap_kernel(x_ref, w_ref, s_ref, b_ref, o_ref, *, k, dil, act):
    Ho, Wo, Cout = o_ref.shape[1], o_ref.shape[2], o_ref.shape[3]
    sc = s_ref[...]                              # (1, Cout) f32
    bs = b_ref[...]
    for r in range(Ho):
        acc = jnp.zeros((Wo, Cout), jnp.float32)
        for dh in range(k):
            row = r + dh * dil
            for dw in range(k):
                xs = x_ref[0, row, dw * dil:dw * dil + Wo, :]   # (Wo, Cin)
                acc = acc + jnp.dot(xs, w_ref[k * dh + dw],
                                    preferred_element_type=jnp.float32)
        y = _apply_act(acc * sc + bs, act)
        o_ref[0, r] = y.astype(o_ref.dtype)


def conv_kxk_bn_act(x, p, act, padding=1, dilation=1, out_dtype=BF16):
    """KxK stride-1 conv + folded BN + act, no im2col materialized in HBM."""
    N, H, W, C = x.shape
    w = p['w']                                   # (k*k, Cin, Cout) bf16
    kk, _, Cout = w.shape
    k = int(round(np.sqrt(kk)))
    Ho = H + 2 * padding - dilation * (k - 1)
    Wo = W + 2 * padding - dilation * (k - 1)
    xp = x.astype(BF16)
    if padding:
        xp = jnp.pad(xp, ((0, 0), (padding, padding), (padding, padding),
                          (0, 0)))
    Hp, Wp = xp.shape[1], xp.shape[2]
    return pl.pallas_call(
        functools.partial(_conv_tap_kernel, k=k, dil=dilation, act=act),
        out_shape=jax.ShapeDtypeStruct((N, Ho, Wo, Cout), out_dtype),
        grid=(N,),
        in_specs=[
            pl.BlockSpec((1, Hp, Wp, C), lambda n: (n, 0, 0, 0)),
            pl.BlockSpec((kk, C, Cout), lambda n: (0, 0, 0)),
            pl.BlockSpec((1, Cout), lambda n: (0, 0)),
            pl.BlockSpec((1, Cout), lambda n: (0, 0)),
        ],
        out_specs=pl.BlockSpec((1, Ho, Wo, Cout), lambda n: (n, 0, 0, 0)),
        compiler_params=_cparams(1),
    )(xp, w, p['s'].reshape(1, Cout), p['b'].reshape(1, Cout))


# ---------------------------------------------------------------------------
# Depthwise 3x3 conv kernels (row-wise accumulation; direct stride-2)
# ---------------------------------------------------------------------------
def _dw_s1_kernel(x_ref, w_ref, s_ref, b_ref, o_ref):
    Ho, Wo, C = o_ref.shape[1], o_ref.shape[2], o_ref.shape[3]
    sc = s_ref[...]
    bs = b_ref[...]
    for r in range(Ho):
        acc = jnp.zeros((Wo, C), jnp.float32)
        for dh in range(3):
            for dw in range(3):
                acc = acc + (x_ref[0, r + dh, dw:dw + Wo, :]
                             .astype(jnp.float32) * w_ref[3 * dh + dw])
        y = jnp.clip(acc * sc + bs, 0.0, 6.0)
        o_ref[0, r] = y.astype(o_ref.dtype)


def _dw_s2_kernel(x_ref, w_ref, s_ref, b_ref, o_ref):
    # x_ref holds the 4 polyphase components of the padded image:
    #   phase(a, b) = padded_x[a::2, b::2], so
    #   padded_x[2r+dh, 2c+dw] == phase(dh & 1, dw & 1)[r + dh//2, c + dw//2].
    Ho, Wo, C = o_ref.shape[1], o_ref.shape[2], o_ref.shape[3]
    sc = s_ref[...]
    bs = b_ref[...]
    for r in range(Ho):
        acc = jnp.zeros((Wo, C), jnp.float32)
        for dh in range(3):
            for dw in range(3):
                ph = 2 * (dh % 2) + (dw % 2)
                co = dw // 2
                acc = acc + (x_ref[ph, r + dh // 2, co:co + Wo, :]
                             .astype(jnp.float32) * w_ref[3 * dh + dw])
        y = jnp.clip(acc * sc + bs, 0.0, 6.0)
        o_ref[0, r] = y.astype(o_ref.dtype)


def depthwise_bn_relu6(x, p, stride=1):
    N, H, W, C = x.shape
    w = p['w']                                   # (9, 1, C) f32
    s = p['s'].reshape(1, C)
    b = p['b'].reshape(1, C)
    if stride == 1:
        xp = jnp.pad(x.astype(BF16), ((0, 0), (1, 1), (1, 1), (0, 0)))
        Hp, Wp = H + 2, W + 2
        return pl.pallas_call(
            _dw_s1_kernel,
            out_shape=jax.ShapeDtypeStruct((N, H, W, C), BF16),
            grid=(N,),
            in_specs=[
                pl.BlockSpec((1, Hp, Wp, C), lambda n: (n, 0, 0, 0)),
                pl.BlockSpec((9, 1, C), lambda n: (0, 0, 0)),
                pl.BlockSpec((1, C), lambda n: (0, 0)),
                pl.BlockSpec((1, C), lambda n: (0, 0)),
            ],
            out_specs=pl.BlockSpec((1, H, W, C), lambda n: (n, 0, 0, 0)),
            compiler_params=_cparams(1),
        )(xp, w, s, b)

    # stride 2: polyphase split (XLA glue) so the kernel needs only contiguous
    # slices and computes exactly the strided output -- no 4x wasted work.
    Ho = (H - 1) // 2 + 1
    Wo = (W - 1) // 2 + 1
    Hp = max(H + 2, 2 * Ho + 2)
    Wp = max(W + 2, 2 * Wo + 2)
    xp = jnp.pad(x.astype(BF16),
                 ((0, 0), (1, Hp - H - 1), (1, Wp - W - 1), (0, 0)))
    Hph, Wph = Ho + 1, Wo + 1
    phases = jnp.stack(
        [xp[:, a::2, bb::2, :][:, :Hph, :Wph, :]
         for a in (0, 1) for bb in (0, 1)], axis=1)
    phases = phases.reshape(N * 4, Hph, Wph, C)
    return pl.pallas_call(
        _dw_s2_kernel,
        out_shape=jax.ShapeDtypeStruct((N, Ho, Wo, C), BF16),
        grid=(N,),
        in_specs=[
            pl.BlockSpec((4, Hph, Wph, C), lambda n: (n, 0, 0, 0)),
            pl.BlockSpec((9, 1, C), lambda n: (0, 0, 0)),
            pl.BlockSpec((1, C), lambda n: (0, 0)),
            pl.BlockSpec((1, C), lambda n: (0, 0)),
        ],
        out_specs=pl.BlockSpec((1, Ho, Wo, C), lambda n: (n, 0, 0, 0)),
        compiler_params=_cparams(1),
    )(phases, w, s, b)


# ---------------------------------------------------------------------------
# Global average pool
# ---------------------------------------------------------------------------
def _gap_kernel(x_ref, o_ref):
    o_ref[...] = jnp.mean(x_ref[...].astype(jnp.float32), axis=(1, 2),
                          keepdims=True).astype(o_ref.dtype)


def global_avg_pool(x):
    N, H, W, C = x.shape
    return pl.pallas_call(
        _gap_kernel,
        out_shape=jax.ShapeDtypeStruct((N, 1, 1, C), BF16),
        grid=(N,),
        in_specs=[pl.BlockSpec((1, H, W, C), lambda n: (n, 0, 0, 0))],
        out_specs=pl.BlockSpec((1, 1, 1, C), lambda n: (n, 0, 0, 0)),
        compiler_params=_cparams(1),
    )(x.astype(BF16))


# ---------------------------------------------------------------------------
# Bilinear resize (align_corners=True), single fused kernel
# ---------------------------------------------------------------------------
def _interp_taps(out_size, in_size):
    """Per output index: 2 source taps + weights (align_corners=True)."""
    i0 = np.zeros((out_size,), np.int64)
    i1 = np.zeros((out_size,), np.int64)
    a0 = np.ones((out_size,), np.float64)
    a1 = np.zeros((out_size,), np.float64)
    if in_size > 1 and out_size > 1:
        scale = (in_size - 1) / (out_size - 1)
        for o in range(out_size):
            src = o * scale
            f = min(int(np.floor(src)), in_size - 1)
            c = min(f + 1, in_size - 1)
            t = src - f
            i0[o], i1[o], a0[o], a1[o] = f, c, 1.0 - t, t
    return i0, i1, a0, a1


def _interp_matrix(out_size, in_size):
    i0, i1, a0, a1 = _interp_taps(out_size, in_size)
    R = np.zeros((out_size, in_size), np.float32)
    for o in range(out_size):
        R[o, i0[o]] += a0[o]
        R[o, i1[o]] += a1[o]
    return jnp.asarray(R)


def _resize_kernel(x_ref, rw_ref, o_ref, *, taps_h, act):
    i0, i1, a0, a1 = taps_h                      # static numpy taps
    Ho = o_ref.shape[1]
    rw = rw_ref[...]                             # (Wo, Win) f32
    for r in range(Ho):
        t = float(a0[r]) * x_ref[0, int(i0[r])].astype(jnp.float32)
        if float(a1[r]) != 0.0:
            t = t + float(a1[r]) * x_ref[0, int(i1[r])].astype(jnp.float32)
        y = jnp.dot(rw, t, preferred_element_type=jnp.float32)   # (Wo, C)
        o_ref[0, r] = _apply_act(y, act).astype(o_ref.dtype)


def bilinear_resize(x, Ho, Wo, act=ACT_NONE, out_dtype=BF16):
    """F.interpolate(mode='bilinear', align_corners=True), one kernel."""
    N, H, W, C = x.shape
    taps_h = _interp_taps(Ho, H)
    rw = _interp_matrix(Wo, W)
    return pl.pallas_call(
        functools.partial(_resize_kernel, taps_h=taps_h, act=act),
        out_shape=jax.ShapeDtypeStruct((N, Ho, Wo, C), out_dtype),
        grid=(N,),
        in_specs=[
            pl.BlockSpec((1, H, W, C), lambda n: (n, 0, 0, 0)),
            pl.BlockSpec((Wo, W), lambda n: (0, 0)),
        ],
        out_specs=pl.BlockSpec((1, Ho, Wo, C), lambda n: (n, 0, 0, 0)),
        compiler_params=_cparams(1),
    )(x.astype(BF16), rw)


# ---------------------------------------------------------------------------
# Deterministic synthetic parameters (folded BN)
# ---------------------------------------------------------------------------
class ParamGen:
    def __init__(self, seed):
        self._key = jax.random.PRNGKey(seed)

    def normal(self, shape, std=1.0):
        self._key, k = jax.random.split(self._key)
        return std * jax.random.normal(k, shape, dtype=jnp.float32)


def _fold_bn(gamma, beta, mean, var, conv_bias=None, eps=1e-5):
    scale = gamma / jnp.sqrt(var + eps)
    bias = beta - mean * scale
    if conv_bias is not None:
        bias = bias + conv_bias * scale
    return scale, bias


def make_conv_bn(pg, cin, cout, k=1, conv_bias=False, depthwise=False):
    if depthwise:
        w = pg.normal((k * k, 1, cout), 1.0 / np.sqrt(k * k))      # f32 (VPU)
    elif k == 1:
        w = pg.normal((cin, cout), 1.0 / np.sqrt(cin)).astype(BF16)
    else:
        w = pg.normal((k * k, cin, cout),
                      1.0 / np.sqrt(cin * k * k)).astype(BF16)
    gamma = 1.0 + pg.normal((cout,), 0.05)
    beta = pg.normal((cout,), 0.05)
    mean = pg.normal((cout,), 0.05)
    var = 1.0 + 0.1 * jnp.abs(pg.normal((cout,)))
    cb = pg.normal((cout,), 0.05) if conv_bias else None
    scale, bias = _fold_bn(gamma, beta, mean, var, cb)
    return {'w': w, 's': scale, 'b': bias}


MOBILENET_V2_CFG = [  # (expand_t, out_c, repeats, stride)
    (1, 16, 1, 1),
    (6, 24, 2, 2),
    (6, 32, 3, 2),
    (6, 64, 4, 2),
    (6, 96, 3, 1),
    (6, 160, 3, 2),
    (6, 320, 1, 1),
]


def build_params(seed, num_classes):
    pg = ParamGen(seed)
    backbone = [{'type': 'stem', **make_conv_bn(pg, 3, 32, k=3)}]
    cin = 32
    for t, c, n, s in MOBILENET_V2_CFG:
        for i in range(n):
            stride = s if i == 0 else 1
            hidden = cin * t
            blk = {'type': 'ir', 'stride': stride,
                   'use_res': (stride == 1 and cin == c)}
            if t != 1:
                blk['expand'] = make_conv_bn(pg, cin, hidden, k=1)
            blk['dw'] = make_conv_bn(pg, hidden, hidden, k=3, depthwise=True)
            blk['proj'] = make_conv_bn(pg, hidden, c, k=1)
            backbone.append(blk)
            cin = c
    aspp = {
        'b1': make_conv_bn(pg, 320, 256, k=1, conv_bias=True),
        'b2': make_conv_bn(pg, 320, 256, k=3, conv_bias=True),
        'b3': make_conv_bn(pg, 320, 256, k=3, conv_bias=True),
        'b4': make_conv_bn(pg, 320, 256, k=3, conv_bias=True),
        'b5': make_conv_bn(pg, 320, 256, k=1, conv_bias=True),
        'cat': make_conv_bn(pg, 256 * 5, 256, k=1, conv_bias=True),
    }
    ncp = _round_up(num_classes, 128)
    cls_w = pg.normal((9, 256, num_classes), 1.0 / np.sqrt(256 * 9))
    cls_w = jnp.pad(cls_w, ((0, 0), (0, 0), (0, ncp - num_classes)))
    cls_b = jnp.pad(pg.normal((num_classes,), 0.05), (0, ncp - num_classes))
    head = {
        'shortcut': make_conv_bn(pg, 24, 48, k=1, conv_bias=True),
        'cat1': make_conv_bn(pg, 48 + 256, 256, k=3),
        'cat2': make_conv_bn(pg, 256, 256, k=3),
        # classifier: 3x3 conv with bias, no BN; channels zero-padded to 128
        # for lane-dense stores, sliced back after the final resize.
        'cls': {'w': cls_w.astype(BF16),
                's': jnp.ones((ncp,), jnp.float32),
                'b': cls_b.astype(jnp.float32)},
    }
    return {'backbone': backbone, 'aspp': aspp, 'head': head,
            'num_classes': num_classes}


# ---------------------------------------------------------------------------
# Forward pass
# ---------------------------------------------------------------------------
def stem_conv(x, p):
    """3x3 stride-2 conv + BN + ReLU6.  Cin=3, so a cheap XLA-side im2col
    feeding the Pallas matmul is kept (9x of a 3-channel input is tiny)."""
    N, H, W, C = x.shape
    Ho = (H - 1) // 2 + 1
    Wo = (W - 1) // 2 + 1
    xp = jnp.pad(x, ((0, 0), (1, 1), (1, 1), (0, 0)))
    cols = []
    for dh in range(3):
        for dw in range(3):
            cols.append(xp[:, dh:dh + 2 * (Ho - 1) + 1:2,
                           dw:dw + 2 * (Wo - 1) + 1:2, :])
    patches = jnp.concatenate(cols, axis=-1).reshape(N * Ho * Wo, 9 * C)
    y = matmul_fused([patches], [p['w'].reshape(9 * C, -1)], p['s'], p['b'],
                     act=ACT_RELU6)
    return y.reshape(N, Ho, Wo, -1)


def inverted_residual(x, p):
    h = x
    if 'expand' in p:
        h = pointwise_bn_act(h, p['expand'], ACT_RELU6)
    h = depthwise_bn_relu6(h, p['dw'], stride=p['stride'])
    res = x if p['use_res'] else None     # skip-add fused into the proj matmul
    return pointwise_bn_act(h, p['proj'], ACT_NONE, res=res)


def run_backbone(x, layers):
    feats = []
    for p in layers:
        if p['type'] == 'stem':
            x = stem_conv(x, p)
        else:
            x = inverted_residual(x, p)
        feats.append(x)
    return feats


def run_aspp(x, p, rate=1):
    N, H, W, _ = x.shape
    M = N * H * W
    b1 = pointwise_bn_act(x, p['b1'], ACT_RELU)
    b2 = conv_kxk_bn_act(x, p['b2'], ACT_RELU, padding=6 * rate,
                         dilation=6 * rate)
    b3 = conv_kxk_bn_act(x, p['b3'], ACT_RELU, padding=12 * rate,
                         dilation=12 * rate)
    b4 = conv_kxk_bn_act(x, p['b4'], ACT_RELU, padding=18 * rate,
                         dilation=18 * rate)
    # Branch 5 (global pooling): its bilinear upsample back to (H, W) is a
    # spatially-constant broadcast, so its contribution to the 1x1 "cat" conv
    # collapses to a per-batch vector added (pre-scaled by the folded BN
    # scale) as a residual -- no resize kernel, no concat.
    g = global_avg_pool(x)                                    # (N,1,1,320)
    g = pointwise_bn_act(g, p['b5'], ACT_RELU)                # (N,1,1,256)
    wc = p['cat']['w']                                        # (1280,256)
    gv = matmul_fused([g.reshape(N, 256)], [wc[1024:1280]],
                      out_dtype=jnp.float32)                  # (N,256)
    gv = gv * p['cat']['s'][None, :]
    res = jnp.broadcast_to(gv[:, None, :], (N, H * W, 256)).reshape(M, 256)
    # "concat + 1x1 conv" without materializing the 1280-channel concat.
    xs = [b.reshape(M, 256) for b in (b1, b2, b3, b4)]
    ws = [wc[0:256], wc[256:512], wc[512:768], wc[768:1024]]
    y = matmul_fused(xs, ws, p['cat']['s'], p['cat']['b'], act=ACT_RELU,
                     res=res)
    return y.reshape(N, H, W, 256)


def deeplabv3plus_forward(x_nchw, params, downsample_factor=16):
    x = jnp.transpose(x_nchw, (0, 2, 3, 1)).astype(jnp.float32)  # NCHW -> NHWC
    H, W = x.shape[1], x.shape[2]

    feats = run_backbone(x, params['backbone'])
    low_level = feats[2]          # features[2]  : (N, H/4,  W/4, 24)
    deep = feats[-1]              # features[-2] : (N, H/32, W/32, 320)

    y = run_aspp(deep, params['aspp'], rate=16 // downsample_factor)

    low_level = pointwise_bn_act(low_level, params['head']['shortcut'],
                                 ACT_RELU)

    y = bilinear_resize(y, low_level.shape[1], low_level.shape[2])
    # TODO(synk): this concat could also be folded into the cat1 tap kernel
    # (two-operand variant) to save one HBM pass of the 304-channel tensor.
    y = jnp.concatenate([y, low_level.astype(BF16)], axis=-1)

    y = conv_kxk_bn_act(y, params['head']['cat1'], ACT_RELU, padding=1)
    # Dropout(0.5): identity in eval mode.
    y = conv_kxk_bn_act(y, params['head']['cat2'], ACT_RELU, padding=1)
    # Dropout(0.1): identity in eval mode.

    y = conv_kxk_bn_act(y, params['head']['cls'], ACT_NONE, padding=0)
    y = bilinear_resize(y, H, W, act=ACT_SIGMOID, out_dtype=jnp.float32)
    y = y[..., :params['num_classes']]          # drop lane-padding channels
    return jnp.transpose(y, (0, 3, 1, 2))


if __name__ == "__main__":
    NUM_CLASSES = 3
    key = jax.random.PRNGKey(0)
    x = jax.random.normal(key, (2, 3, 64, 64), dtype=jnp.float32)  # NCHW

    params = build_params(seed=0, num_classes=NUM_CLASSES)
    out = deeplabv3plus_forward(x, params)
    out = jax.block_until_ready(out)

    assert out.shape == (2, NUM_CLASSES, 64, 64), out.shape
    assert bool(jnp.all(jnp.isfinite(out)))
    assert bool(jnp.all((out >= 0.0) & (out <= 1.0)))  # sigmoid output range
    print("KERNEL_OK")
</pallas_src>

<mosaic_0001>
module attributes {stable_mosaic.version = 11 : i64} {
  func.func @_mm_fused_kernel(%arg0: i32, %arg1: memref<256x27xbf16, #tpu.memory_space<vmem>>, %arg2: memref<27x32xbf16, #tpu.memory_space<vmem>>, %arg3: memref<1x32xf32, #tpu.memory_space<vmem>>, %arg4: memref<1x32xf32, #tpu.memory_space<vmem>>, %arg5: memref<256x32xbf16, #tpu.memory_space<vmem>>) attributes {dimension_semantics = [#tpu.dimension_semantics<parallel>], iteration_bounds = array<i64: 8>, scalar_prefetch = 0 : i64, scratch_operands = 0 : i64, tpu.core_type = #tpu.core_type<tc>, window_params = [{transform_indices = @transform_0, window_bounds = array<i64: 256, 27>}, {pipeline_mode = #tpu.pipeline_mode<synchronous>, transform_indices = @transform_1, window_bounds = array<i64: 27, 32>}, {pipeline_mode = #tpu.pipeline_mode<synchronous>, transform_indices = @transform_2, window_bounds = array<i64: 1, 32>}, {pipeline_mode = #tpu.pipeline_mode<synchronous>, transform_indices = @transform_3, window_bounds = array<i64: 1, 32>}, {transform_indices = @transform_4, window_bounds = array<i64: 256, 32>}]} {
    %c0 = arith.constant 0 : index
    %c0_0 = arith.constant 0 : index
    %0 = vector.load %arg1[%c0, %c0_0] : memref<256x27xbf16, #tpu.memory_space<vmem>>, vector<256x27xbf16>
    %c0_1 = arith.constant 0 : index
    %c0_2 = arith.constant 0 : index
    %1 = vector.load %arg2[%c0_1, %c0_2] : memref<27x32xbf16, #tpu.memory_space<vmem>>, vector<27x32xbf16>
    %cst = arith.constant dense<0.000000e+00> : vector<256x32xf32>
    %2 = tpu.matmul %0, %1, %cst {dimension_numbers = #tpu.dot_dimension_numbers<[1], [0], [0], [1], [0, 0, 1, 1], [], []>} : vector<256x27xbf16>, vector<27x32xbf16>, vector<256x32xf32> -> vector<256x32xf32>
    %c0_3 = arith.constant 0 : index
    %c0_4 = arith.constant 0 : index
    %3 = vector.load %arg3[%c0_3, %c0_4] : memref<1x32xf32, #tpu.memory_space<vmem>>, vector<1x32xf32>
    %4 = vector.broadcast %3 : vector<1x32xf32> to vector<256x32xf32>
    %5 = arith.mulf %2, %4 : vector<256x32xf32>
    %c0_5 = arith.constant 0 : index
    %c0_6 = arith.constant 0 : index
    %6 = vector.load %arg4[%c0_5, %c0_6] : memref<1x32xf32, #tpu.memory_space<vmem>>, vector<1x32xf32>
    %7 = vector.broadcast %6 : vector<1x32xf32> to vector<256x32xf32>
    %8 = arith.addf %5, %7 : vector<256x32xf32>
    %cst_7 = arith.constant 0.000000e+00 : f32
    %cst_8 = arith.constant 6.000000e+00 : f32
    %9 = vector.broadcast %cst_7 : f32 to vector<256x32xf32>
    %10 = arith.maximumf %9, %8 : vector<256x32xf32>
    %11 = vector.broadcast %cst_8 : f32 to vector<256x32xf32>
    %12 = arith.minimumf %11, %10 : vector<256x32xf32>
    %13 = arith.truncf %12 : vector<256x32xf32> to vector<256x32xbf16>
    %c0_9 = arith.constant 0 : index
    %c0_10 = arith.constant 0 : index
    %14 = vector.load %arg5[%c0_9, %c0_10] : memref<256x32xbf16, #tpu.memory_space<vmem>>, vector<256x32xbf16>
    tpu.vector_store %arg5[%c0_9, %c0_10], %13 {strides = array<i32>} : memref<256x32xbf16, #tpu.memory_space<vmem>>, vector<256x32xbf16>,
    return
  }
  func.func @transform_0(%arg0: i32) -> (i32, i32) {
    %c0_i32 = arith.constant 0 : i32
    %c0_i32_0 = arith.constant 0 : i32
    return %arg0, %c0_i32 : i32, i32
  }
  func.func @transform_1(%arg0: i32) -> (i32, i32) {
    %c0_i32 = arith.constant 0 : i32
    %c0_i32_0 = arith.constant 0 : i32
    %c0_i32_1 = arith.constant 0 : i32
    return %c0_i32, %c0_i32_0 : i32, i32
  }
  func.func @transform_2(%arg0: i32) -> (i32, i32) {
    %c0_i32 = arith.constant 0 : i32
    %c0_i32_0 = arith.constant 0 : i32
    %c0_i32_1 = arith.constant 0 : i32
    return %c0_i32, %c0_i32_0 : i32, i32
  }
  func.func @transform_3(%arg0: i32) -> (i32, i32) {
    %c0_i32 = arith.constant 0 : i32
    %c0_i32_0 = arith.constant 0 : i32
    %c0_i32_1 = arith.constant 0 : i32
    return %c0_i32, %c0_i32_0 : i32, i32
  }
  func.func @transform_4(%arg0: i32) -> (i32, i32) {
    %c0_i32 = arith.constant 0 : i32
    %c0_i32_0 = arith.constant 0 : i32
    return %arg0, %c0_i32 : i32, i32
  }
}

</mosaic_0001>

<bundles_post_ra>
// kernel: tpu_custom_call.1
= control target key start
LH: loop header
LB: loop body
LE: loop exit
PB: predicated region body
PF: predicated region fallthrough
CT: control target
= control target key end

     0   :  { %s1135_s15 = smov 0   ;;  %s1339_s0 = inlined_call_operand.vmem [shape: bf16[2048,27], index: 0, kind: input, shape index: {}]   ;;  %s1340_s1 = inlined_call_operand.vmem [shape: bf16[27,32], index: 1, kind: input, shape index: {}]   ;;  %s1341_s2 = inlined_call_operand.vmem [shape: f32[1,32], index: 2, kind: input, shape index: {}]   ;;  %s1342_s3 = inlined_call_operand.vmem [shape: f32[1,32], index: 3, kind: input, shape index: {}]   ;;  %s1343_s4 = inlined_call_operand.vmem [shape: bf16[2048,32], index: 4, kind: output, shape index: {}]  }
   0x1 LB: > { %s905_s16 = sadd.s32 4294967295, %s1107_s15   ;;  %p909_p0 = scmp.ge.s32.totalorder %s1107_s15, 1  ;;  %s1107_s15 = sphi %s1135_s15, %s14_s15  }
   0x2   : > { %p163_p1 = scmp.lt.s32.totalorder %s1107_s15, 9 }
   0x4   : > { %p164_p2 = pnand %p909_p0, %p163_p1 }
   0x5   : > { %v1083_v0 = vld [vmem:[%s1340_s1] sm:$0xff] (!%p164_p2)   ;;  %vm378_vm0 = vcmask (!%p164_p2), 1044480   ;;  %v1084_v1 = vld [vmem:[%s1340_s1 + $0x8] sm:$0x3f] (!%p164_p2)   ;;  %vm379_vm1 = vcmask (!%p164_p2), 1045504   ;;  %s910_s21 = sshll.u32 (!%p164_p2), %s905_s16, 5 }
   0x6   : > { %167 = sbr.rel (%p164_p2) target bundleno = 277 (0x115), region = 36  ;;  %1034 = vmatprep.subr.bf16.mxu0 (!%p164_p2), %v1083_v0  ;;  %1070 = vmatprep.subr.bf16.mxu1 (!%p164_p2), %v1083_v0  ;;  %v1109_v2 = vmov (!%p164_p2), 65535   ;;  %p190_p3 = scmp.lt.s32.totalorder (!%p164_p2), %s910_s21, 255  ;;  %vm329_vm2 = vcmask (!%p164_p2), 220160   ;;  %v1194_v22 = vld [vmem:[%s1341_s2] ss:$0 sm:$0xff] (!%p164_p2) }
   0x7   : > { %1035 = vmatpush3.bf16.msra.mxu0 (!%p164_p2), %v1083_v0  ;;  %1072 = vmatpush3.bf16.msra.mxu1 (!%p164_p2), %v1083_v0  ;;  %v380_v3 = vsel (!%p164_p2), %vm378_vm0, 4294967295, %v1109_v2  ;;  %v1199_v24 = vld [vmem:[%s1342_s3] ss:$0 sm:$0xff] (!%p164_p2)  ;;  %vm816_vm3 = vcmask (!%p164_p2), 257024  }
   0x8   : > { %v381_v4 = vsel (!%p164_p2), %vm379_vm1, %v380_v3, 0 }
   0x9   : > { %v383_v5 = vand.u32 (!%p164_p2), %v1084_v1, %v381_v4 }
   0xb   : > { %1036 = vmatprep.subr.bf16.mxu0 (!%p164_p2), %v383_v5  ;;  %1071 = vmatprep.subr.bf16.mxu1 (!%p164_p2), %v383_v5 }
   0xc   : > { %1037 = vmatpush3.bf16.msra.mxu0 (!%p164_p2), %v383_v5  ;;  %1073 = vmatpush3.bf16.msra.mxu1 (!%p164_p2), %v383_v5 }
   0xd   : > { %s1345_s21 = smov (!%p190_p3, %s910_s21), 255 }
   0xe   : > { %s911_s22 = sshll.u32 %s1345_s21, 2 }
   0xf   : > { %s1157_s25 = scalar_lea.vmem %s1339_s0, %s911_s22  ;;  %s1222_s6 = scalar_lea.vmem %s1343_s4, %s911_s22 }
  0x10   : > { %v1085_v6 = vld [vmem:[%s1157_s25] sm:$0xff]   ;;  %v1087_v8 = vld [vmem:[%s1157_s25 + $0x8] sm:$0xff]   ;;  %v1089_v10 = vld [vmem:[%s1157_s25 + $0x10] sm:$0xff]  }
  0x11   : > { %v1086_v7 = vld [vmem:[%s1157_s25 + $0x40] sm:$0xff]   ;;  %1038 = vmatprep.mubr.msk.bf16.mxu0 %vm329_vm2, %v1085_v6  ;;  %v1088_v9 = vld [vmem:[%s1157_s25 + $0x48] sm:$0xff]   ;;  %v1090_v11 = vld [vmem:[%s1157_s25 + $0x50] sm:$0xff]  }
  0x12   : > { %1054 = vmatprep.mubr.msk.bf16.mxu1 %vm329_vm2, %v1086_v7  ;;  %1039 = vmatmul.mubr.msk.bf16.vlgmr.msra.gmra.mrb[0].mxu0 %vm329_vm2, %v1087_v8  ;;  %v1091_v12 = vld [vmem:[%s1157_s25 + $0x18] sm:$0xff]   ;;  %v1093_v14 = vld [vmem:[%s1157_s25 + $0x20] sm:$0xff]   ;;  %v1095_v16 = vld [vmem:[%s1157_s25 + $0x28] sm:$0xff]  }
  0x13   : > { %1055 = vmatmul.mubr.msk.bf16.vlgmr.msra.gmra.mrb[0].mxu1 %vm329_vm2, %v1088_v9  ;;  %1042 = vmatprep.mubr.msk.bf16.mxu0 %vm329_vm2, %v1089_v10  ;;  %v1092_v13 = vld [vmem:[%s1157_s25 + $0x58] sm:$0xff]   ;;  %v1094_v15 = vld [vmem:[%s1157_s25 + $0x60] sm:$0xff]   ;;  %v1096_v17 = vld [vmem:[%s1157_s25 + $0x68] sm:$0xff]  }
  0x14   : > { %1058 = vmatprep.mubr.msk.bf16.mxu1 %vm329_vm2, %v1090_v11  ;;  %v1097_v18 = vld [vmem:[%s1157_s25 + $0x30] sm:$0xff]   ;;  %v1099_v20 = vld [vmem:[%s1157_s25 + $0x38] sm:$0xff]  }
  0x15   : > { %v1098_v19 = vld [vmem:[%s1157_s25 + $0x70] sm:$0xff]   ;;  %v1100_v21 = vld [vmem:[%s1157_s25 + $0x78] sm:$0xff]  }
  0x1a   : > { %1043 = vmatmul.mubr.msk.bf16.gmra.mrb[4].mxu0 %vm329_vm2, %v1091_v12 }
  0x1b   : > { %1059 = vmatmul.mubr.msk.bf16.gmra.mrb[4].mxu1 %vm329_vm2, %v1092_v13  ;;  %1046 = vmatprep.mubr.msk.bf16.mxu0 %vm329_vm2, %v1093_v14 }
  0x1c   : > { %1062 = vmatprep.mubr.msk.bf16.mxu1 %vm329_vm2, %v1094_v15 }
  0x22   : > { %1047 = vmatmul.mubr.msk.bf16.gmra.mrb[8].mxu0 %vm329_vm2, %v1095_v16 }
  0x23   : > { %1063 = vmatmul.mubr.msk.bf16.gmra.mrb[8].mxu1 %vm329_vm2, %v1096_v17  ;;  %1050 = vmatprep.mubr.msk.bf16.mxu0 %vm329_vm2, %v1097_v18 }
  0x24   : > { %1066 = vmatprep.mubr.msk.bf16.mxu1 %vm329_vm2, %v1098_v19 }
  0x2a   : > { %1051 = vmatmul.mubr.msk.bf16.gmra.mrb[12].mxu0 %vm329_vm2, %v1099_v20 }
  0x2b   : > { %1067 = vmatmul.mubr.msk.bf16.gmra.mrb[12].mxu1 %vm329_vm2, %v1100_v21 }
  0xe5   : > { %v1040_v23 = vpop.f32.mrb[0].mxu0 }
  0xe6   : > { %v555_v25 = vmul.f32 %v1040_v23, %v1194_v22  ;;  %v1056_v26 = vpop.f32.mrb[0].mxu1  ;;  %v419_v27 = vpop.f32.mrb[1].mxu0 }
  0xe7   : > { %v571_v28 = vmul.f32 %v1056_v26, %v1194_v22  ;;  %v553_v29 = vmul.f32 %v1194_v22, %v419_v27  ;;  %v483_v30 = vpop.f32.mrb[1].mxu1  ;;  %v1041_v31 = vpop.f32.mrb[2].mxu0 }
  0xe8   : > { %v594_v32 = vadd.f32 %v1199_v24, %v555_v25  ;;  %v569_v33 = vmul.f32 %v1194_v22, %v483_v30  ;;  %v556_v34 = vmul.f32 %v1041_v31, %v1194_v22  ;;  %v1057_v35 = vpop.f32.mrb[2].mxu1  ;;  %v422_v36 = vpop.f32.mrb[3].mxu0 }
  0xe9   : > { %v610_v37 = vadd.f32 %v1199_v24, %v571_v28  ;;  %v592_v38 = vadd.f32 %v1199_v24, %v553_v29  ;;  %v572_v39 = vmul.f32 %v1057_v35, %v1194_v22  ;;  %v554_v40 = vmul.f32 %v1194_v22, %v422_v36  ;;  %v486_v41 = vpop.f32.mrb[3].mxu1 }
  0xea   : > { %v626_v42 = vmax.f32 %v594_v32, 0.0  ;;  %v608_v43 = vadd.f32 %v1199_v24, %v569_v33  ;;  %v595_v44 = vadd.f32 %v1199_v24, %v556_v34  ;;  %v570_v45 = vmul.f32 %v1194_v22, %v486_v41 }
  0xeb   : > { %v642_v46 = vmax.f32 %v610_v37, 0.0  ;;  %v624_v47 = vmax.f32 %v592_v38, 0.0  ;;  %v611_v48 = vadd.f32 %v1199_v24, %v572_v39  ;;  %v593_v49 = vadd.f32 %v1199_v24, %v554_v40 }
  0xec   : > { %v658_v50 = vmin.f32 %v626_v42, 6.0  ;;  %v640_v51 = vmax.f32 %v608_v43, 0.0  ;;  %v627_v52 = vmax.f32 %v595_v44, 0.0  ;;  %v609_v53 = vadd.f32 %v1199_v24, %v570_v45 }
  0xed   : > { %v674_v54 = vmin.f32 %v642_v46, 6.0  ;;  %v656_v55 = vmin.f32 %v624_v47, 6.0  ;;  %v643_v56 = vmax.f32 %v611_v48, 0.0  ;;  %v625_v57 = vmax.f32 %v593_v49, 0.0  ;;  %v1044_v58 = vpop.f32.mrb[4].mxu0 }
  0xee   : > { %v986_v59 = vpack.c.bf16 %v658_v50, %v658_v50  ;;  %v672_v60 = vmin.f32 %v640_v51, 6.0  ;;  %v659_v61 = vmin.f32 %v627_v52, 6.0  ;;  %v641_v62 = vmax.f32 %v609_v53, 0.0  ;;  %v1060_v63 = vpop.f32.mrb[4].mxu1  ;;  %v435_v0 = vpop.f32.mrb[5].mxu0 }
  0xef   : > { %v1002_v1 = vpack.c.bf16 %v674_v54, %v674_v54  ;;  %v984_v2 = vpack.c.bf16 %v656_v55, %v656_v55  ;;  %v675_v3 = vmin.f32 %v643_v56, 6.0  ;;  %v657_v4 = vmin.f32 %v625_v57, 6.0  ;;  %v499_v5 = vpop.f32.mrb[5].mxu1  ;;  %v1045_v6 = vpop.f32.mrb[6].mxu0 }
  0xf0   : > { %819 = vst.msk [vmem:[%s1222_s6 + $0x8] sm:$0xf] %vm816_vm3, %v986_v59  ;;  %v1000_v7 = vpack.c.bf16 %v672_v60, %v672_v60  ;;  %v987_v8 = vpack.c.bf16 %v659_v61, %v659_v61  ;;  %v673_v9 = vmin.f32 %v641_v62, 6.0  ;;  %v559_v10 = vmul.f32 %v1044_v58, %v1194_v22  ;;  %v1061_v11 = vpop.f32.mrb[6].mxu1  ;;  %v438_v12 = vpop.f32.mrb[7].mxu0 }
  0xf1   : > { %835 = vst.msk [vmem:[%s1222_s6 + $0x48] sm:$0xf] %vm816_vm3, %v1002_v1  ;;  %817 = vst.msk [vmem:[%s1222_s6] sm:$0xf] %vm816_vm3, %v984_v2  ;;  %v1003_v13 = vpack.c.bf16 %v675_v3, %v675_v3  ;;  %v985_v14 = vpack.c.bf16 %v657_v4, %v657_v4  ;;  %v575_v15 = vmul.f32 %v1060_v63, %v1194_v22  ;;  %v502_v17 = vpop.f32.mrb[7].mxu1 }
  0xf2   : > { %v557_v16 = vmul.f32 %v1194_v22, %v435_v0  ;;  %833 = vst.msk [vmem:[%s1222_s6 + $0x40] sm:$0xf] %vm816_vm3, %v1000_v7  ;;  %820 = vst.msk [vmem:[%s1222_s6 + $0xc] sm:$0xf] %vm816_vm3, %v987_v8  ;;  %v1001_v18 = vpack.c.bf16 %v673_v9, %v673_v9  ;;  %v598_v19 = vadd.f32 %v1199_v24, %v559_v10 }
  0xf3   : > { %v573_v20 = vmul.f32 %v1194_v22, %v499_v5  ;;  %v560_v21 = vmul.f32 %v1045_v6, %v1194_v22  ;;  %836 = vst.msk [vmem:[%s1222_s6 + $0x4c] sm:$0xf] %vm816_vm3, %v1003_v13  ;;  %818 = vst.msk [vmem:[%s1222_s6 + $0x4] sm:$0xf] %vm816_vm3, %v985_v14  ;;  %v614_v23 = vadd.f32 %v1199_v24, %v575_v15 }
  0xf4   : > { %v596_v25 = vadd.f32 %v1199_v24, %v557_v16  ;;  %v576_v26 = vmul.f32 %v1061_v11, %v1194_v22  ;;  %v558_v27 = vmul.f32 %v1194_v22, %v438_v12  ;;  %834 = vst.msk [vmem:[%s1222_s6 + $0x44] sm:$0xf] %vm816_vm3, %v1001_v18  ;;  %v630_v28 = vmax.f32 %v598_v19, 0.0 }
  0xf5   : > { %v612_v29 = vadd.f32 %v1199_v24, %v573_v20  ;;  %v599_v30 = vadd.f32 %v1199_v24, %v560_v21  ;;  %v574_v31 = vmul.f32 %v1194_v22, %v502_v17  ;;  %v646_v32 = vmax.f32 %v614_v23, 0.0  ;;  %v1048_v36 = vpop.f32.mrb[8].mxu0 }
  0xf6   : > { %v628_v33 = vmax.f32 %v596_v25, 0.0  ;;  %v615_v34 = vadd.f32 %v1199_v24, %v576_v26  ;;  %v597_v35 = vadd.f32 %v1199_v24, %v558_v27  ;;  %v662_v37 = vmin.f32 %v630_v28, 6.0  ;;  %v1064_v41 = vpop.f32.mrb[8].mxu1  ;;  %v451_v42 = vpop.f32.mrb[9].mxu0 }
  0xf7   : > { %v644_v38 = vmax.f32 %v612_v29, 0.0  ;;  %v631_v39 = vmax.f32 %v599_v30, 0.0  ;;  %v613_v40 = vadd.f32 %v1199_v24, %v574_v31  ;;  %v678_v43 = vmin.f32 %v646_v32, 6.0  ;;  %v515_v47 = vpop.f32.mrb[9].mxu1  ;;  %v1049_v48 = vpop.f32.mrb[10].mxu0 }
  0xf8   : > { %v660_v44 = vmin.f32 %v628_v33, 6.0  ;;  %v647_v45 = vmax.f32 %v615_v34, 0.0  ;;  %v629_v46 = vmax.f32 %v597_v35, 0.0  ;;  %v990_v49 = vpack.c.bf16 %v662_v37, %v662_v37  ;;  %v1065_v53 = vpop.f32.mrb[10].mxu1  ;;  %v454_v54 = vpop.f32.mrb[11].mxu0 }
  0xf9   : > { %v676_v50 = vmin.f32 %v644_v38, 6.0  ;;  %v663_v51 = vmin.f32 %v631_v39, 6.0  ;;  %v645_v52 = vmax.f32 %v613_v40, 0.0  ;;  %v1006_v55 = vpack.c.bf16 %v678_v43, %v678_v43  ;;  %v518_v59 = vpop.f32.mrb[11].mxu1 }
  0xfa   : > { %v988_v56 = vpack.c.bf16 %v660_v44, %v660_v44  ;;  %v679_v57 = vmin.f32 %v647_v45, 6.0  ;;  %v661_v58 = vmin.f32 %v629_v46, 6.0  ;;  %823 = vst.msk [vmem:[%s1222_s6 + $0x18] sm:$0xf] %vm816_vm3, %v990_v49  ;;  %v563_v63 = vmul.f32 %v1048_v36, %v1194_v22 }
  0xfb   : > { %v1004_v60 = vpack.c.bf16 %v676_v50, %v676_v50  ;;  %v991_v61 = vpack.c.bf16 %v663_v51, %v663_v51  ;;  %v677_v62 = vmin.f32 %v645_v52, 6.0  ;;  %839 = vst.msk [vmem:[%s1222_s6 + $0x58] sm:$0xf] %vm816_vm3, %v1006_v55  ;;  %v579_v2 = vmul.f32 %v1064_v41, %v1194_v22 }
  0xfc   : > { %821 = vst.msk [vmem:[%s1222_s6 + $0x10] sm:$0xf] %vm816_vm3, %v988_v56  ;;  %v1007_v0 = vpack.c.bf16 %v679_v57, %v679_v57  ;;  %v989_v1 = vpack.c.bf16 %v661_v58, %v661_v58  ;;  %v561_v3 = vmul.f32 %v1194_v22, %v451_v42  ;;  %v602_v5 = vadd.f32 %v1199_v24, %v563_v63 }
  0xfd   : > { %837 = vst.msk [vmem:[%s1222_s6 + $0x50] sm:$0xf] %vm816_vm3, %v1004_v60  ;;  %824 = vst.msk [vmem:[%s1222_s6 + $0x1c] sm:$0xf] %vm816_vm3, %v991_v61  ;;  %v1005_v4 = vpack.c.bf16 %v677_v62, %v677_v62  ;;  %v577_v6 = vmul.f32 %v1194_v22, %v515_v47  ;;  %v564_v7 = vmul.f32 %v1049_v48, %v1194_v22  ;;  %v1052_v12 = vpop.f32.mrb[12].mxu0 }
  0xfe   : > { %840 = vst.msk [vmem:[%s1222_s6 + $0x5c] sm:$0xf] %vm816_vm3, %v1007_v0  ;;  %822 = vst.msk [vmem:[%s1222_s6 + $0x14] sm:$0xf] %vm816_vm3, %v989_v1  ;;  %v618_v8 = vadd.f32 %v1199_v24, %v579_v2  ;;  %v600_v9 = vadd.f32 %v1199_v24, %v561_v3  ;;  %v580_v10 = vmul.f32 %v1065_v53, %v1194_v22  ;;  %v634_v13 = vmax.f32 %v602_v5, 0.0  ;;  %v1068_v17 = vpop.f32.mrb[12].mxu1 }
  0xff   : > { %v562_v11 = vmul.f32 %v1194_v22, %v454_v54  ;;  %838 = vst.msk [vmem:[%s1222_s6 + $0x54] sm:$0xf] %vm816_vm3, %v1005_v4  ;;  %v616_v14 = vadd.f32 %v1199_v24, %v577_v6  ;;  %v603_v15 = vadd.f32 %v1199_v24, %v564_v7  ;;  %v578_v16 = vmul.f32 %v1194_v22, %v518_v59  ;;  %v467_v18 = vpop.f32.mrb[13].mxu0  ;;  %v531_v25 = vpop.f32.mrb[13].mxu1 }
 0x100   : > { %v650_v19 = vmax.f32 %v618_v8, 0.0  ;;  %v632_v20 = vmax.f32 %v600_v9, 0.0  ;;  %v619_v21 = vadd.f32 %v1199_v24, %v580_v10  ;;  %v1053_v26 = vpop.f32.mrb[14].mxu0  ;;  %v666_v27 = vmin.f32 %v634_v13, 6.0  ;;  %v1069_v31 = vpop.f32.mrb[14].mxu1 }
 0x101   : > { %v601_v23 = vadd.f32 %v1199_v24, %v562_v11  ;;  %v648_v28 = vmax.f32 %v616_v14, 0.0  ;;  %v635_v29 = vmax.f32 %v603_v15, 0.0  ;;  %v617_v30 = vadd.f32 %v1199_v24, %v578_v16  ;;  %v470_v32 = vpop.f32.mrb[15].mxu0  ;;  %v534_v37 = vpop.f32.mrb[15].mxu1 }
 0x102   : > { %v682_v33 = vmin.f32 %v650_v19, 6.0  ;;  %v664_v34 = vmin.f32 %v632_v20, 6.0  ;;  %v651_v35 = vmax.f32 %v619_v21, 0.0  ;;  %v994_v38 = vpack.c.bf16 %v666_v27, %v666_v27 }
 0x103   : > { %v633_v36 = vmax.f32 %v601_v23, 0.0  ;;  %v680_v39 = vmin.f32 %v648_v28, 6.0  ;;  %v667_v40 = vmin.f32 %v635_v29, 6.0  ;;  %v649_v41 = vmax.f32 %v617_v30, 0.0 }
 0x104   : > { %v1010_v42 = vpack.c.bf16 %v682_v33, %v682_v33  ;;  %v992_v43 = vpack.c.bf16 %v664_v34, %v664_v34  ;;  %v683_v44 = vmin.f32 %v651_v35, 6.0  ;;  %827 = vst.msk [vmem:[%s1222_s6 + $0x28] sm:$0xf] %vm816_vm3, %v994_v38  ;;  %v567_v49 = vmul.f32 %v1052_v12, %v1194_v22 }
 0x105   : > { %v665_v45 = vmin.f32 %v633_v36, 6.0  ;;  %v1008_v46 = vpack.c.bf16 %v680_v39, %v680_v39  ;;  %v995_v47 = vpack.c.bf16 %v667_v40, %v667_v40  ;;  %v681_v48 = vmin.f32 %v649_v41, 6.0 }
 0x106   : > { %843 = vst.msk [vmem:[%s1222_s6 + $0x68] sm:$0xf] %vm816_vm3, %v1010_v42  ;;  %825 = vst.msk [vmem:[%s1222_s6 + $0x20] sm:$0xf] %vm816_vm3, %v992_v43  ;;  %v1011_v50 = vpack.c.bf16 %v683_v44, %v683_v44  ;;  %v583_v52 = vmul.f32 %v1068_v17, %v1194_v22  ;;  %v565_v53 = vmul.f32 %v1194_v22, %v467_v18 }
 0x107   : > { %v993_v51 = vpack.c.bf16 %v665_v45, %v665_v45  ;;  %841 = vst.msk [vmem:[%s1222_s6 + $0x60] sm:$0xf] %vm816_vm3, %v1008_v46  ;;  %828 = vst.msk [vmem:[%s1222_s6 + $0x2c] sm:$0xf] %vm816_vm3, %v995_v47  ;;  %v1009_v54 = vpack.c.bf16 %v681_v48, %v681_v48  ;;  %v606_v55 = vadd.f32 %v1199_v24, %v567_v49 }
 0x108   : > { %v581_v56 = vmul.f32 %v1194_v22, %v531_v25  ;;  %v568_v57 = vmul.f32 %v1053_v26, %v1194_v22  ;;  %844 = vst.msk [vmem:[%s1222_s6 + $0x6c] sm:$0xf] %vm816_vm3, %v1011_v50  ;;  %v622_v58 = vadd.f32 %v1199_v24, %v583_v52  ;;  %v604_v59 = vadd.f32 %v1199_v24, %v565_v53 }
 0x109   : > { %826 = vst.msk [vmem:[%s1222_s6 + $0x24] sm:$0xf] %vm816_vm3, %v993_v51  ;;  %v584_v60 = vmul.f32 %v1069_v31, %v1194_v22  ;;  %v566_v61 = vmul.f32 %v1194_v22, %v470_v32  ;;  %842 = vst.msk [vmem:[%s1222_s6 + $0x64] sm:$0xf] %vm816_vm3, %v1009_v54  ;;  %v638_v62 = vmax.f32 %v606_v55, 0.0  ;;  %v582_v1 = vmul.f32 %v1194_v22, %v534_v37 }
 0x10a   : > { %v620_v63 = vadd.f32 %v1199_v24, %v581_v56  ;;  %v607_v0 = vadd.f32 %v1199_v24, %v568_v57  ;;  %v654_v2 = vmax.f32 %v622_v58, 0.0  ;;  %v636_v3 = vmax.f32 %v604_v59, 0.0 }
 0x10b   : > { %v623_v4 = vadd.f32 %v1199_v24, %v584_v60  ;;  %v605_v5 = vadd.f32 %v1199_v24, %v566_v61  ;;  %v670_v6 = vmin.f32 %v638_v62, 6.0  ;;  %v621_v9 = vadd.f32 %v1199_v24, %v582_v1 }
 0x10c   : > { %v652_v7 = vmax.f32 %v620_v63, 0.0  ;;  %v639_v8 = vmax.f32 %v607_v0, 0.0  ;;  %v686_v10 = vmin.f32 %v654_v2, 6.0  ;;  %v668_v11 = vmin.f32 %v636_v3, 6.0 }
 0x10d   : > { %v655_v12 = vmax.f32 %v623_v4, 0.0  ;;  %v637_v13 = vmax.f32 %v605_v5, 0.0  ;;  %v998_v14 = vpack.c.bf16 %v670_v6, %v670_v6  ;;  %v653_v16 = vmax.f32 %v621_v9, 0.0 }
 0x10e   : > { %v684_v22 = vmin.f32 %v652_v7, 6.0  ;;  %v671_v15 = vmin.f32 %v639_v8, 6.0  ;;  %v1014_v17 = vpack.c.bf16 %v686_v10, %v686_v10  ;;  %v996_v18 = vpack.c.bf16 %v668_v11, %v668_v11 }
 0x10f   : > { %v687_v19 = vmin.f32 %v655_v12, 6.0  ;;  %v669_v20 = vmin.f32 %v637_v13, 6.0  ;;  %831 = vst.msk [vmem:[%s1222_s6 + $0x38] sm:$0xf] %vm816_vm3, %v998_v14  ;;  %v685_v23 = vmin.f32 %v653_v16, 6.0 }
 0x110   : > { %v1012_v24 = vpack.c.bf16 %v684_v22, %v684_v22  ;;  %v999_v21 = vpack.c.bf16 %v671_v15, %v671_v15  ;;  %847 = vst.msk [vmem:[%s1222_s6 + $0x78] sm:$0xf] %vm816_vm3, %v1014_v17  ;;  %829 = vst.msk [vmem:[%s1222_s6 + $0x30] sm:$0xf] %vm816_vm3, %v996_v18 }
 0x111   : > { %v1015_v25 = vpack.c.bf16 %v687_v19, %v687_v19  ;;  %v997_v26 = vpack.c.bf16 %v669_v20, %v669_v20  ;;  %v1013_v27 = vpack.c.bf16 %v685_v23, %v685_v23 }
 0x112   : > { %845 = vst.msk [vmem:[%s1222_s6 + $0x70] sm:$0xf] %vm816_vm3, %v1012_v24  ;;  %832 = vst.msk [vmem:[%s1222_s6 + $0x3c] sm:$0xf] %vm816_vm3, %v999_v21 }
 0x113   : > { %848 = vst.msk [vmem:[%s1222_s6 + $0x7c] sm:$0xf] %vm816_vm3, %v1015_v25  ;;  %830 = vst.msk [vmem:[%s1222_s6 + $0x34] sm:$0xf] %vm816_vm3, %v997_v26 }
 0x114   : > { %846 = vst.msk [vmem:[%s1222_s6 + $0x74] sm:$0xf] %vm816_vm3, %v1013_v27 }
 0x115 PF: > { %s14_s15 = sadd.s32 1, %s1107_s15  }
 0x116   : > { %p11_p4 = scmp.ge.s32.totalorder %s14_s15, 10  }
 0x118   :  { %13 = sbr.rel (!%p11_p4) target bundleno = 1 (0x1), region = 66 }

</bundles_post_ra>
